<compile_context>
chip_gen: v5e
topology: v5e:2x2
jax: 0.10.0
libtpu: 0.0.40
codegen_flags: <defaults>
</compile_context>

<pallas_src>
import jax
import jax.numpy as jnp
from jax.experimental import pallas as pl
from jax.experimental.pallas import tpu as pltpu

LANE = 128
SUBLANE = 8
# Safe on v7x (64 MiB physical VMEM).  On v5e / v6e (128 MiB) this can be
# raised toward ~100 MiB together with larger tm/tk.
VMEM_LIMIT = 48 * 1024 * 1024
# Keep the activation matrix fully VMEM-resident below this size.
M_RESIDENT_BYTES = 8 * 1024 * 1024


def _round_up(x, m):
    return ((x + m - 1) // m) * m


def _pad2(a, rows, cols, dtype):
    a = jnp.asarray(a)
    a = jnp.pad(a, ((0, rows - a.shape[0]), (0, cols - a.shape[1])))
    return a.astype(dtype)


def _padded_num_nodes(n):
    n_pad = _round_up(n, LANE)
    if n_pad > 1024:
        n_pad = _round_up(n_pad, 512)
    return n_pad


def _choose_tiles(n_pad):
    """(tm, tk) for the GCN-layer grid.

    Small/medium graphs: one reduction block, two row blocks (both v7x TCs
    busy, no per-step overhead).  Large graphs: 1024x512 / 512x512 tiles.
    """
    if n_pad <= 1024:
        return max(n_pad // 2, SUBLANE), n_pad
    tm = 1024 if n_pad % 1024 == 0 else 512
    return tm, 512


def _choose_pool_tk(n_pad):
    if n_pad <= 4096:
        return n_pad
    for cand in (2048, 1024, 512):
        if n_pad % cand == 0:
            return cand
    return LANE


# ---------------------------------------------------------------------------
# Fused GCN layer:  out = relu((A @ M) @ W + b)
#   A : [N, N]   bf16   M : [N, Fin] bf16
#   W : [Fin, Fout] bf16   b : [1, Fout] f32   out : [N, Fout] bf16
# grid = (N//TM [parallel rows], N//TK [arbitrary reduction over A columns])
# ---------------------------------------------------------------------------
def _make_gcn_kernel(m_resident, tk):
    def kernel(a_ref, m_ref, w_ref, b_ref, out_ref, acc_ref):
        k = pl.program_id(1)

        @pl.when(k == 0)
        def _():
            acc_ref[...] = jnp.zeros_like(acc_ref)

        if m_resident:
            # M lives fully in VMEM; slice the reduction block out of it.
            start = pl.multiple_of(k * tk, tk)
            m_blk = m_ref[pl.ds(start, tk), :]
        else:
            m_blk = m_ref[...]

        # Dominant N^2-sized matmul: bf16 operands, f32 accumulation (MXU).
        acc_ref[...] += jnp.dot(a_ref[...], m_blk,
                                preferred_element_type=jnp.float32)

        @pl.when(k == pl.num_programs(1) - 1)
        def _():
            # Epilogue: small feature transform on the MXU's native bf16 path
            # (f32 accumulation), bias + ReLU in f32, bf16 only at the store.
            h = jnp.dot(acc_ref[...].astype(jnp.bfloat16), w_ref[...],
                        preferred_element_type=jnp.float32) + b_ref[...]
            out_ref[...] = jnp.maximum(h, 0.0).astype(out_ref.dtype)

    return kernel


def gcn_layer(adj_bf16, m_bf16, w_bf16, b_f32, *, tm, tk):
    n = adj_bf16.shape[0]
    fin = m_bf16.shape[1]
    fout = w_bf16.shape[1]
    grid = (n // tm, n // tk)

    m_resident = n * fin * 2 <= M_RESIDENT_BYTES
    if m_resident:
        # Constant index_map -> DMA'd once, stays resident across the grid.
        m_spec = pl.BlockSpec((n, fin), lambda i, k: (0, 0))
    else:
        m_spec = pl.BlockSpec((tk, fin), lambda i, k: (k, 0))

    if grid[1] >= 4:
        # Deeper A pipeline keeps the HBM stream busy across the epilogue.
        a_spec = pl.BlockSpec((tm, tk), lambda i, k: (i, k),
                              pipeline_mode=pl.Buffered(3))
    else:
        a_spec = pl.BlockSpec((tm, tk), lambda i, k: (i, k))

    flops = 2 * n * n * fin + 2 * n * fin * fout
    bytes_accessed = (n * n * 2 + n * fin * 2 + fin * fout * 2
                      + fout * 4 + n * fout * 2)

    return pl.pallas_call(
        _make_gcn_kernel(m_resident, tk),
        out_shape=jax.ShapeDtypeStruct((n, fout), jnp.bfloat16),
        grid=grid,
        in_specs=[
            a_spec,                                           # Ahat tile
            m_spec,                                           # activations
            pl.BlockSpec((fin, fout), lambda i, k: (0, 0)),   # W (resident)
            pl.BlockSpec((1, fout), lambda i, k: (0, 0)),     # bias (resident)
        ],
        out_specs=pl.BlockSpec((tm, fout), lambda i, k: (i, 0)),
        scratch_shapes=[pltpu.VMEM((tm, fin), jnp.float32)],
        compiler_params=pltpu.CompilerParams(
            dimension_semantics=("parallel", "arbitrary"),
            vmem_limit_bytes=VMEM_LIMIT),
        cost_estimate=pl.CostEstimate(flops=flops, transcendentals=0,
                                      bytes_accessed=bytes_accessed),
    )(adj_bf16, m_bf16, w_bf16, b_f32)


# ---------------------------------------------------------------------------
# Pool + head:  out = (P @ h) @ Wlin + blin
#   P : [G, N] bf16   h : [N, H] bf16   Wlin : [H, Cout] f32   blin : [1, Cout]
# grid = (N//TK,) reduction over nodes, resident [G, H] f32 accumulator.
# ---------------------------------------------------------------------------
def _pool_head_kernel(p_ref, h_ref, wl_ref, bl_ref, out_ref, acc_ref):
    k = pl.program_id(0)

    @pl.when(k == 0)
    def _():
        acc_ref[...] = jnp.zeros_like(acc_ref)

    # bf16 x bf16 with f32 accumulation (no in-kernel f32 upcast of h).
    acc_ref[...] += jnp.dot(p_ref[...], h_ref[...],
                            preferred_element_type=jnp.float32)

    @pl.when(k == pl.num_programs(0) - 1)
    def _():
        out_ref[...] = jnp.dot(acc_ref[...], wl_ref[...],
                               preferred_element_type=jnp.float32) + bl_ref[...]


def pool_head(pool_bf16, h_bf16, wlin_f32, blin_f32, *, tk):
    g, n = pool_bf16.shape
    h = h_bf16.shape[1]
    cout = wlin_f32.shape[1]
    grid = (n // tk,)
    flops = 2 * g * n * h + 2 * g * h * cout
    bytes_accessed = g * n * 2 + n * h * 2 + h * cout * 4 + g * cout * 4
    return pl.pallas_call(
        _pool_head_kernel,
        out_shape=jax.ShapeDtypeStruct((g, cout), jnp.float32),
        grid=grid,
        in_specs=[
            pl.BlockSpec((g, tk), lambda k: (0, k)),
            pl.BlockSpec((tk, h), lambda k: (k, 0)),
            pl.BlockSpec((h, cout), lambda k: (0, 0)),
            pl.BlockSpec((1, cout), lambda k: (0, 0)),
        ],
        out_specs=pl.BlockSpec((g, cout), lambda k: (0, 0)),
        scratch_shapes=[pltpu.VMEM((g, h), jnp.float32)],
        compiler_params=pltpu.CompilerParams(
            dimension_semantics=("arbitrary",),
            vmem_limit_bytes=VMEM_LIMIT),
        cost_estimate=pl.CostEstimate(flops=flops, transcendentals=0,
                                      bytes_accessed=bytes_accessed),
    )(pool_bf16, h_bf16, wlin_f32, blin_f32)


# ---------------------------------------------------------------------------
# Graph preprocessing: build Ahat and the mean-pool matrix directly at the
# padded size in the streaming dtype (one transient N_pad^2 f32 intermediate,
# no extra pad/cast copies).
# ---------------------------------------------------------------------------
def build_dense_graph(edge_index, batch, num_nodes, num_graphs, *,
                      num_nodes_padded=None, num_graphs_padded=None,
                      dtype=jnp.bfloat16):
    """edge_index/batch -> dense GCN-normalized adjacency + mean-pool matrix.

    Matches PyG GCNConv defaults: duplicate edges scatter-ADD, every node
    gets exactly one unit self-loop, Ahat = D^-1/2 (A+I) D^-1/2.
    Padded rows/columns are all zero so the padded math stays exact.
    """
    n_pad = num_nodes if num_nodes_padded is None else num_nodes_padded
    g_pad = num_graphs if num_graphs_padded is None else num_graphs_padded

    src, dst = edge_index[0], edge_index[1]
    node_mask = jnp.arange(n_pad) < num_nodes

    adj = jnp.zeros((n_pad, n_pad), jnp.float32).at[dst, src].add(1.0)
    eye = jnp.eye(n_pad, dtype=jnp.float32) * node_mask[None, :]
    adj = adj * (1.0 - eye) + eye  # unit self-loops for real nodes only
    deg = jnp.sum(adj, axis=1)
    dinv_sqrt = jnp.where(deg > 0, jax.lax.rsqrt(deg), 0.0)
    adj_norm = (dinv_sqrt[:, None] * adj * dinv_sqrt[None, :]).astype(dtype)

    # mean-pool matrix P[g, i] = 1/|graph g| if batch[i] == g (pad graph = -1)
    batch_p = jnp.pad(batch.astype(jnp.int32), (0, n_pad - num_nodes),
                      constant_values=-1)
    onehot = (batch_p[None, :] == jnp.arange(g_pad)[:, None]).astype(jnp.float32)
    counts = jnp.maximum(jnp.sum(onehot, axis=1, keepdims=True), 1.0)
    pool = (onehot / counts).astype(dtype)
    return adj_norm, pool


# ---------------------------------------------------------------------------
# Full forward pass
# ---------------------------------------------------------------------------
def gnn_oracle_pallas(adj_p, pool_p, x, w1, b1, w2, b2, wlin, blin, *,
                      num_graphs):
    n_pad = adj_p.shape[0]
    c_in = x.shape[1]
    hdim = w1.shape[1]
    c_out = wlin.shape[1]

    tm, tk = _choose_tiles(n_pad)

    c_in_p = _round_up(c_in, LANE)
    h_p = _round_up(hdim, LANE)
    c_out_p = _round_up(c_out, LANE)

    # Small operands: lane-dense zero padding (exact math on padded dims).
    x_p = _pad2(x, n_pad, c_in_p, jnp.bfloat16)
    w1_p = _pad2(w1, c_in_p, h_p, jnp.bfloat16)
    b1_p = _pad2(b1, 1, h_p, jnp.float32)
    w2_p = _pad2(w2, h_p, h_p, jnp.bfloat16)
    b2_p = _pad2(b2, 1, h_p, jnp.float32)
    wlin_p = _pad2(wlin, h_p, c_out_p, jnp.float32)
    blin_p = _pad2(blin, 1, c_out_p, jnp.float32)

    h1 = gcn_layer(adj_p, x_p, w1_p, b1_p, tm=tm, tk=tk)   # [n_pad, h_p] bf16
    h2 = gcn_layer(adj_p, h1, w2_p, b2_p, tm=tm, tk=tk)    # [n_pad, h_p] bf16
    out = pool_head(pool_p, h2, wlin_p, blin_p,
                    tk=_choose_pool_tk(n_pad))              # [g_p, c_out_p] f32
    return out[:num_graphs, :c_out]


if __name__ == "__main__":
    # Small deterministic problem: 2 ring graphs of 8 nodes each.
    N = 16          # total nodes
    G = 2           # graphs in the batch
    C_IN = 8        # in_channels
    H = 32          # hidden_channels
    C_OUT = 4       # out_channels

    key = jax.random.PRNGKey(0)
    k_x, k_w1, k_w2, k_wl, k_bl = jax.random.split(key, 5)

    x = jax.random.normal(k_x, (N, C_IN), dtype=jnp.float32)
    batch = jnp.concatenate([jnp.zeros(8, jnp.int32), jnp.ones(8, jnp.int32)])

    edges = []
    for off in (0, 8):
        for i in range(8):
            a, b = off + i, off + (i + 1) % 8
            edges.append((a, b))
            edges.append((b, a))
    edge_index = jnp.array(edges, dtype=jnp.int32).T  # [2, 32]

    w1 = jax.random.normal(k_w1, (C_IN, H), dtype=jnp.float32) * 0.1
    b1 = jnp.zeros((1, H), jnp.float32)
    w2 = jax.random.normal(k_w2, (H, H), dtype=jnp.float32) * 0.1
    b2 = jnp.zeros((1, H), jnp.float32)
    wlin = jax.random.normal(k_wl, (H, C_OUT), dtype=jnp.float32) * 0.1
    blin = jax.random.normal(k_bl, (1, C_OUT), dtype=jnp.float32) * 0.1

    # Padded bf16 operands for the kernels, built once in streaming dtype.
    N_PAD = _padded_num_nodes(N)
    G_PAD = _round_up(G, SUBLANE)
    adj_p, pool_p = build_dense_graph(edge_index, batch, N, G,
                                      num_nodes_padded=N_PAD,
                                      num_graphs_padded=G_PAD,
                                      dtype=jnp.bfloat16)

    out = gnn_oracle_pallas(adj_p, pool_p, x, w1, b1, w2, b2, wlin, blin,
                            num_graphs=G)
    out = jax.block_until_ready(out)

    # Pure-JAX f32 reference (original operation order, unpadded).
    adj_ref, pool_ref = build_dense_graph(edge_index, batch, N, G,
                                          dtype=jnp.float32)
    h1_ref = jnp.maximum(adj_ref @ (x @ w1) + b1, 0.0)
    h2_ref = jnp.maximum(adj_ref @ (h1_ref @ w2) + b2, 0.0)
    ref = (pool_ref @ h2_ref) @ wlin + blin

    assert out.shape == (G, C_OUT)
    # bf16 streaming of Ahat / activations / W -> slightly looser tolerance.
    assert jnp.allclose(out, ref, atol=2e-2, rtol=2e-2), (out, ref)

    print("KERNEL_OK")
</pallas_src>

<mosaic_0001>
module attributes {stable_mosaic.version = 11 : i64} {
  func.func @kernel(%arg0: i32, %arg1: i32, %arg2: memref<64x128xbf16, #tpu.memory_space<vmem>>, %arg3: memref<128x128xbf16, #tpu.memory_space<vmem>>, %arg4: memref<128x128xbf16, #tpu.memory_space<vmem>>, %arg5: memref<1x128xf32, #tpu.memory_space<vmem>>, %arg6: memref<64x128xbf16, #tpu.memory_space<vmem>>, %arg7: memref<64x128xf32, #tpu.memory_space<vmem>>) attributes {dimension_semantics = [#tpu.dimension_semantics<parallel>, #tpu.dimension_semantics<arbitrary>], iteration_bounds = array<i64: 2, 1>, scalar_prefetch = 0 : i64, scratch_operands = 1 : i64, tpu.core_type = #tpu.core_type<tc>, window_params = [{transform_indices = @transform_0, window_bounds = array<i64: 64, 128>}, {pipeline_mode = #tpu.pipeline_mode<synchronous>, transform_indices = @transform_1, window_bounds = array<i64: 128, 128>}, {pipeline_mode = #tpu.pipeline_mode<synchronous>, transform_indices = @transform_2, window_bounds = array<i64: 128, 128>}, {pipeline_mode = #tpu.pipeline_mode<synchronous>, transform_indices = @transform_3, window_bounds = array<i64: 1, 128>}, {transform_indices = @transform_4, window_bounds = array<i64: 64, 128>}]} {
    %c0_i32 = arith.constant 0 : i32
    %0 = arith.cmpi eq, %arg1, %c0_i32 : i32
    %1 = arith.extui %0 : i1 to i32
    %c0_i32_0 = arith.constant 0 : i32
    %2 = arith.cmpi ne, %1, %c0_i32_0 : i32
    scf.if %2 {
      %cst_9 = arith.constant 0.000000e+00 : f32
      %15 = vector.broadcast %cst_9 : f32 to vector<64x128xf32>
      %c0_10 = arith.constant 0 : index
      %c0_11 = arith.constant 0 : index
      %16 = vector.load %arg7[%c0_10, %c0_11] : memref<64x128xf32, #tpu.memory_space<vmem>>, vector<64x128xf32>
      tpu.vector_store %arg7[%c0_10, %c0_11], %15 {strides = array<i32>} : memref<64x128xf32, #tpu.memory_space<vmem>>, vector<64x128xf32>,
    } else {
    }
    %c128_i32 = arith.constant 128 : i32
    %3 = arith.muli %arg1, %c128_i32 : i32
    %4 = tpu.assume_multiple %3, 128 : i32
    %5 = arith.index_cast %4 : i32 to index
    %c0 = arith.constant 0 : index
    %6 = vector.load %arg3[%5, %c0] : memref<128x128xbf16, #tpu.memory_space<vmem>>, vector<128x128xbf16>
    %c0_1 = arith.constant 0 : index
    %c0_2 = arith.constant 0 : index
    %7 = vector.load %arg7[%c0_1, %c0_2] : memref<64x128xf32, #tpu.memory_space<vmem>>, vector<64x128xf32>
    %c0_3 = arith.constant 0 : index
    %c0_4 = arith.constant 0 : index
    %8 = vector.load %arg2[%c0_3, %c0_4] : memref<64x128xbf16, #tpu.memory_space<vmem>>, vector<64x128xbf16>
    %cst = arith.constant dense<0.000000e+00> : vector<64x128xf32>
    %9 = tpu.matmul %8, %6, %cst {dimension_numbers = #tpu.dot_dimension_numbers<[1], [0], [0], [1], [0, 0, 1, 1], [], []>} : vector<64x128xbf16>, vector<128x128xbf16>, vector<64x128xf32> -> vector<64x128xf32>
    %10 = arith.addf %7, %9 : vector<64x128xf32>
    %c0_5 = arith.constant 0 : index
    %c0_6 = arith.constant 0 : index
    %11 = vector.load %arg7[%c0_5, %c0_6] : memref<64x128xf32, #tpu.memory_space<vmem>>, vector<64x128xf32>
    tpu.vector_store %arg7[%c0_5, %c0_6], %10 {strides = array<i32>} : memref<64x128xf32, #tpu.memory_space<vmem>>, vector<64x128xf32>,
    %c0_i32_7 = arith.constant 0 : i32
    %12 = arith.cmpi eq, %arg1, %c0_i32_7 : i32
    %13 = arith.extui %12 : i1 to i32
    %c0_i32_8 = arith.constant 0 : i32
    %14 = arith.cmpi ne, %13, %c0_i32_8 : i32
    scf.if %14 {
      %c0_9 = arith.constant 0 : index
      %c0_10 = arith.constant 0 : index
      %15 = vector.load %arg7[%c0_9, %c0_10] : memref<64x128xf32, #tpu.memory_space<vmem>>, vector<64x128xf32>
      %16 = arith.truncf %15 : vector<64x128xf32> to vector<64x128xbf16>
      %c0_11 = arith.constant 0 : index
      %c0_12 = arith.constant 0 : index
      %17 = vector.load %arg4[%c0_11, %c0_12] : memref<128x128xbf16, #tpu.memory_space<vmem>>, vector<128x128xbf16>
      %cst_13 = arith.constant dense<0.000000e+00> : vector<64x128xf32>
      %18 = tpu.matmul %16, %17, %cst_13 {dimension_numbers = #tpu.dot_dimension_numbers<[1], [0], [0], [1], [0, 0, 1, 1], [], []>} : vector<64x128xbf16>, vector<128x128xbf16>, vector<64x128xf32> -> vector<64x128xf32>
      %c0_14 = arith.constant 0 : index
      %c0_15 = arith.constant 0 : index
      %19 = vector.load %arg5[%c0_14, %c0_15] : memref<1x128xf32, #tpu.memory_space<vmem>>, vector<1x128xf32>
      %20 = vector.broadcast %19 : vector<1x128xf32> to vector<64x128xf32>
      %21 = arith.addf %18, %20 : vector<64x128xf32>
      %cst_16 = arith.constant 0.000000e+00 : f32
      %22 = vector.broadcast %cst_16 : f32 to vector<64x128xf32>
      %23 = arith.maximumf %21, %22 : vector<64x128xf32>
      %24 = arith.truncf %23 : vector<64x128xf32> to vector<64x128xbf16>
      %c0_17 = arith.constant 0 : index
      %c0_18 = arith.constant 0 : index
      %25 = vector.load %arg6[%c0_17, %c0_18] : memref<64x128xbf16, #tpu.memory_space<vmem>>, vector<64x128xbf16>
      tpu.vector_store %arg6[%c0_17, %c0_18], %24 {strides = array<i32>} : memref<64x128xbf16, #tpu.memory_space<vmem>>, vector<64x128xbf16>,
    } else {
    }
    return
  }
  func.func @transform_0(%arg0: i32, %arg1: i32) -> (i32, i32) {
    %c0_i32 = arith.constant 0 : i32
    return %arg0, %arg1 : i32, i32
  }
  func.func @transform_1(%arg0: i32, %arg1: i32) -> (i32, i32) {
    %c0_i32 = arith.constant 0 : i32
    %c0_i32_0 = arith.constant 0 : i32
    %c0_i32_1 = arith.constant 0 : i32
    return %c0_i32, %c0_i32_0 : i32, i32
  }
  func.func @transform_2(%arg0: i32, %arg1: i32) -> (i32, i32) {
    %c0_i32 = arith.constant 0 : i32
    %c0_i32_0 = arith.constant 0 : i32
    %c0_i32_1 = arith.constant 0 : i32
    return %c0_i32, %c0_i32_0 : i32, i32
  }
  func.func @transform_3(%arg0: i32, %arg1: i32) -> (i32, i32) {
    %c0_i32 = arith.constant 0 : i32
    %c0_i32_0 = arith.constant 0 : i32
    %c0_i32_1 = arith.constant 0 : i32
    return %c0_i32, %c0_i32_0 : i32, i32
  }
  func.func @transform_4(%arg0: i32, %arg1: i32) -> (i32, i32) {
    %c0_i32 = arith.constant 0 : i32
    %c0_i32_0 = arith.constant 0 : i32
    return %arg0, %c0_i32 : i32, i32
  }
}

</mosaic_0001>

<bundles_post_ra>
// kernel: tpu_custom_call.1
= control target key start
LH: loop header
LB: loop body
LE: loop exit
PB: predicated region body
PF: predicated region fallthrough
CT: control target
= control target key end

     0   :  { %s1315_s0 = inlined_call_operand.hbm [shape: bf16[128,128], index: 0, kind: input, shape index: {}]   ;;  %s1316_s1 = inlined_call_operand.hbm [shape: bf16[128,128], index: 1, kind: input, shape index: {}]   ;;  %s1317_s2 = inlined_call_operand.hbm [shape: bf16[128,128], index: 2, kind: input, shape index: {}]   ;;  %s1318_s3 = inlined_call_operand.vmem [shape: f32[1,128], index: 3, kind: input, shape index: {}]   ;;  %s1319_s4 = inlined_call_operand.hbm [shape: bf16[128,128], index: 4, kind: output, shape index: {}]  }
   0x1   :  { %1321 = sst [smem:[#allocation13_spill]] %s1316_s1 }
   0x2   :  { %9 = vsyncpa [#allocation4], 0 }
   0x3   :  { %11 = vsyncpa [#allocation4 + $0x1], 0 }
   0x4   :  { %12 = vsyncpa [#allocation7], 0 }
   0x5   :  { %13 = vsyncpa [#allocation5], 0 }
   0x6   :  { %15 = vsyncpa [#allocation5 + $0x1], 0  ;;  %s1147_s15 = smov 0   ;;  %s1149_s16 = smov 0  }
   0x7   :  { %s1151_s17 = smov 0   ;;  %s1153_s18 = smov 0  }
   0x8   :  { %s1155_s19 = smov 0   ;;  %s1157_s20 = smov 0  }
   0x9 LB: > { %s690_s21 = sadd.s32 4294967295, %s1114_s20   ;;  %s691_s22 = sadd.s32 4294967294, %s1114_s20   ;;  %s1114_s20 = sphi %s1157_s20, %s21_s20   ;;  %s1110_s19 = sphi %s1155_s19, %s1333_s19   ;;  %s1106_s18 = sphi %s1153_s18, %s1332_s18   ;;  %s1102_s17 = sphi %s1151_s17, %s1331_s17   ;;  %s1098_s16 = sphi %s1149_s16, %s1330_s16   ;;  %s1094_s15 = sphi %s1147_s15, %s1329_s15  }
   0xa   : > { %p55_p0 = scmp.ne.s32.totalorder %s1098_s16, %s1094_s15  ;;  %p1183_p1 = scmp.eq.s32.totalorder %s690_s21, 0 }
   0xb   : > { %p148_p2 = scmp.eq.s32.totalorder %s691_s22, 1  ;;  %p692_p4 = scmp.ge.s32.totalorder %s1114_s20, 1 }
   0xc   : > { %p1189_p3 = por %p1183_p1, %p55_p0  ;;  %p155_p6 = scmp.lt.s32.totalorder %s1114_s20, 3 }
   0xd   : > { %p1194_p5 = por %p148_p2, %p55_p0  ;;  %s1325_s1 = sld [smem:[#allocation13_spill]] }
   0xe   : > { %p1202_p7 = pnand %p692_p4, %p155_p6  ;;  %s1116_s30 = smov [#allocation6]  }
   0xf   : > { %s168_s5 = sshll.u32 %s1116_s30, 4  ;;  %p695_p10 = scmp.ge.s32.totalorder %s1114_s20, 2  ;;  %s169_s5 = int_to_ptr.vmem [resolvable:$true] %s168_s5 }
  0x10   : > { %p862_p8 = pneg %p1202_p7  ;;  %s180_s8 = sshll.u32 %s1317_s2, 4  ;;  %s181_s8 = int_to_ptr.hbm [resolvable:$true] %s180_s8 }
  0x11   : > { %s1320_s9 = smov 64   ;;  %s1118_s10 = smov 4  }
  0x12   : > { %p863_p9 = pnand %p862_p8, %p1183_p1  ;;  %s1119_s11 = smov [#allocation8]  }
  0x13   : > { %s166_s28 = sshll.u32 %s1325_s1, 4  ;;  %s182_s12 = sshll.u32 %s1119_s11, 4  ;;  %s167_s28 = int_to_ptr.hbm [resolvable:$true] %s166_s28  ;;  %s183_s12 = int_to_ptr.vmem [resolvable:$true] %s182_s12 }
  0x14   : > { %865 = dma.hbm_to_vmem [thread:$0]  (!%p863_p9), %s167_s28, 1024, %s169_s5, [#allocation7], %s1320_s9, %s1320_s9, %s1118_s10  }
  0x15   : > { %868 = dma.hbm_to_vmem [thread:$0]  (!%p863_p9), %s181_s8, 1024, %s183_s12, [#allocation7], %s1320_s9, %s1320_s9, %s1118_s10  }
  0x16   : > { %p142_p11 = scmp.eq.s32.totalorder %s690_s21, 1  ;;  %s33_s13 = sadd.s32 1, %s1110_s19 }
  0x17   : > { %p35_p12 = scmp.ge.s32.totalorder %s33_s13, 2  ;;  %s42_s14 = sadd.s32 1, %s1102_s17 }
  0x18   : > { %p49_p13 = scmp.ne.s32.totalorder %s1102_s17, %s1098_s16  ;;  %p50_p0 = scmp.eq.s32.totalorder %s1114_s20, 0 }
  0x19   : > { %s1335_s13 = smov (%p35_p12, %s33_s13), 0  ;;  %p879_p4 = scmp.lt.s32.totalorder %s1114_s20, 2 }
  0x1a   : > { %p1229_p2 = por %p142_p11, %p49_p13  ;;  %s37_s26 = ssub.s32 %s1110_s19, %s1335_s13 }
  0x1b   : > { %s199_s27 = sand.u32 1, %s1102_s17   ;;  %p40_p6 = scmp.eq.s32.totalorder %s37_s26, 0 }
  0x1c   : > { %p51_p8 = por %p50_p0, %p49_p13  ;;  %s696_s28 = sshll.u32 %s199_s27, 5 }
  0x1d   : > { %s789_s21 = sshll.u32 %s1110_s19, 5  ;;  %s203_s11 = scalar_lea.vmem [#allocation3], %s696_s28 }
  0x1e   : > { %s1239_s30 = scalar_select %p40_p6, %s1102_s17, %s42_s14  }
  0x1f   : > { %s209_s7 = scalar_lea.hbm %s1315_s0, %s789_s21  ;;  %s212_s12 = sshll.u32 %s203_s11, 4  ;;  %s213_s12 = int_to_ptr.vmem [resolvable:$true] %s212_s12 }
  0x20   : > { %s210_s8 = sshll.u32 %s209_s7, 4  ;;  %p870_p9 = pnand %p879_p4, %p51_p8  ;;  %s211_s8 = int_to_ptr.hbm [resolvable:$true] %s210_s8 }
  0x21   : > { %s200_s9 = scalar_lea.sflag [#allocation4], %s199_s27  ;;  %s1328_s1 = smov 64  }
  0x22   : > { %872 = dma.hbm_to_vmem [thread:$0]  (!%p870_p9), %s211_s8, 512, %s213_s12, %s200_s9, %s1328_s1, %s1328_s1, %s1118_s10  }
  0x23   : > { %224 = sbr.rel (%p1202_p7) target bundleno = 383 (0x17f), region = 36  ;;  %s1252_s14 = sand.u32 (!%p1202_p7), 1, %s1098_s16  }
  0x24   : > { %s700_s26 = sshll.u32 (!%p1202_p7), %s1252_s14, 5  ;;  %s227_s28 = scalar_lea.sflag (!%p1202_p7), [#allocation4], %s1252_s14 }
  0x25   : > { %s1258_s21 = scalar_lea.vmem (!%p1202_p7), [#allocation3], %s700_s26 }
  0x28   : > { %1081 = dma.done.wait (%p1189_p3), %s227_s28, 512  }
  0x29   : > { %1083 = vsyncadd (%p1189_p3), %s227_s28, 4294966784 }
  0x2a   : > { %1085 = dma.done.wait (%p1183_p1), [#allocation7], 2048  }
  0x2b   : > { %1087 = vsyncadd (%p1183_p1), [#allocation7], 4294965248  ;;  %v797_v0 = vld [vmem:[#allocation6 + $0x38] sm:$0xff]  ;;  %v796_v1 = vld [vmem:[#allocation6 + $0x30] sm:$0xff]  ;;  %s265_s24 = scalar_lea.vmem [#allocation9], %s700_s26  ;;  %s810_s29 = sshll.u32 %s1106_s18, 5 }
  0x2c   : > { %389 = vmatpush.bf16.msra.mxu0 %v797_v0  ;;  %834 = vmatpush.bf16.msra.mxu2 %v797_v0  ;;  %v795_v2 = vld [vmem:[#allocation6 + $0x28] sm:$0xff]  ;;  %v794_v3 = vld [vmem:[#allocation6 + $0x20] sm:$0xff]  ;;  %v793_v4 = vld [vmem:[#allocation6 + $0x18] sm:$0xff]  ;;  %s582_s27 = scalar_lea.hbm %s1319_s4, %s810_s29  ;;  %s583_s5 = sshll.u32 %s265_s24, 4  ;;  %s584_s5 = int_to_ptr.vmem [resolvable:$true] %s583_s5 }
  0x2d   : > { %v809_v5 = vld [vmem:[#allocation8 + $0x38] sm:$0xff]  ;;  %v792_v6 = vld [vmem:[#allocation6 + $0x10] sm:$0xff]  ;;  %v791_v8 = vld [vmem:[#allocation6 + $0x8] sm:$0xff]  ;;  %s585_s6 = sshll.u32 %s582_s27, 4  ;;  %s571_s7 = scalar_lea.sflag [#allocation5], %s1252_s14  ;;  %s586_s6 = int_to_ptr.hbm [resolvable:$true] %s585_s6 }
  0x2e   : > { %517 = vmatpush.bf16.msra.mxu1 %v809_v5  ;;  %v808_v7 = vld [vmem:[#allocation8 + $0x30] sm:$0xff]  ;;  %842 = vmatpush.bf16.msra.mxu3 %v809_v5  ;;  %v807_v9 = vld [vmem:[#allocation8 + $0x28] sm:$0xff]  ;;  %v790_v10 = vld [vmem:[#allocation6] sm:$0xff]  ;;  %s1042_s8 = sshra.s32 %s586_s6, 4  ;;  %s1048_s26 = scalar_lea.hbm %s1319_s4, 64  ;;  %s1043_s8 = int_to_ptr.hbm [resolvable:$true] %s1042_s8 }
  0x2f   : > { %v806_v11 = vld [vmem:[#allocation8 + $0x20] sm:$0xff]  ;;  %v800_v13 = vld [vmem:[%s1258_s21 + $0x10] sm:$0xff]  ;;  %v805_v14 = vld [vmem:[#allocation8 + $0x18] sm:$0xff]  ;;  %s1044_s18 = scalar_lea.hbm %s1043_s8, 32  ;;  %p1049_p11 = scmp.lt.s32.totalorder %s1043_s8, %s1319_s4 }
  0x30   : > { %390 = vmatpush.bf16.msra.mxu0 %v796_v1  ;;  %835 = vmatpush.bf16.msra.mxu2 %v796_v1  ;;  %v798_v12 = vld [vmem:[%s1258_s21] sm:$0xff]  ;;  %v799_v15 = vld [vmem:[%s1258_s21 + $0x8] sm:$0xff]  ;;  %v801_v16 = vld [vmem:[%s1258_s21 + $0x18] sm:$0xff]  ;;  %p1045_p1 = scmp.ne.s32.totalorder %s1043_s8, %s1044_s18  ;;  %p1050_p12 = scmp.lt.s32.totalorder %s1048_s26, %s1044_s18 }
  0x31   : > { %v804_v17 = vld [vmem:[#allocation8 + $0x10] sm:$0xff]  ;;  %v803_v18 = vld [vmem:[#allocation8 + $0x8] sm:$0xff]  ;;  %v802_v19 = vld [vmem:[#allocation8] sm:$0xff] }
  0x32   : > { %518 = vmatpush.bf16.msra.mxu1 %v808_v7  ;;  %843 = vmatpush.bf16.msra.mxu3 %v808_v7  ;;  %v937_v33 = vld [vmem:[%s1318_s3] ss:$0 sm:$0xff]  ;;  %p1046_p3 = pnand %p1045_p1, %p1229_p2  ;;  %p1051_p13 = por %p1050_p12, %p1049_p11 }
  0x34   : > { %391 = vmatpush.bf16.msra.mxu0 %v795_v2  ;;  %836 = vmatpush.bf16.msra.mxu2 %v795_v2  ;;  %p1047_p7 = pneg %p1046_p3 }
  0x36   : > { %519 = vmatpush.bf16.msra.mxu1 %v807_v9  ;;  %844 = vmatpush.bf16.msra.mxu3 %v807_v9  ;;  %p1052_p0 = pnand %p1051_p13, %p1047_p7 }
  0x38   : > { %392 = vmatpush.bf16.msra.mxu0 %v794_v3  ;;  %837 = vmatpush.bf16.msra.mxu2 %v794_v3 }
  0x3a   : > { %520 = vmatpush.bf16.msra.mxu1 %v806_v11  ;;  %845 = vmatpush.bf16.msra.mxu3 %v806_v11 }
  0x3c   : > { %393 = vmatpush.bf16.msra.mxu0 %v793_v4  ;;  %838 = vmatpush.bf16.msra.mxu2 %v793_v4 }
  0x3e   : > { %521 = vmatpush.bf16.msra.mxu1 %v805_v14  ;;  %846 = vmatpush.bf16.msra.mxu3 %v805_v14 }
  0x40   : > { %394 = vmatpush.bf16.msra.mxu0 %v792_v6  ;;  %839 = vmatpush.bf16.msra.mxu2 %v792_v6 }
  0x42   : > { %522 = vmatpush.bf16.msra.mxu1 %v804_v17  ;;  %847 = vmatpush.bf16.msra.mxu3 %v804_v17 }
  0x44   : > { %395 = vmatpush.bf16.msra.mxu0 %v791_v8  ;;  %840 = vmatpush.bf16.msra.mxu2 %v791_v8 }
  0x46   : > { %523 = vmatpush.bf16.msra.mxu1 %v803_v18  ;;  %848 = vmatpush.bf16.msra.mxu3 %v803_v18 }
  0x48   : > { %396 = vmatpush.bf16.msra.mxu0 %v790_v10  ;;  %841 = vmatpush.bf16.msra.mxu2 %v790_v10 }
  0x4a   : > { %524 = vmatpush.bf16.msra.mxu1 %v802_v19  ;;  %849 = vmatpush.bf16.msra.mxu3 %v802_v19 }
  0x4b   : > { %397 = vmatmul.bf16.vlgmr.msra.gmra.mxu0 %v798_v12  ;;  %407 = vmatmul.bf16.vlgmr.msra.gmra.mxu2 %v800_v13 }
  0x5b   : > { %402 = vmatmul.bf16.gmra.mxu0 %v799_v15  ;;  %412 = vmatmul.bf16.gmra.mxu2 %v801_v16 }
  0xc8   : > { %v398_v20 = vpop.f32.mrf.mxu0 }
  0xce   : > { %v408_v21 = vpop.f32.mrf.mxu2 }
  0xd0   : > { %v400_v22 = vpop.f32.mrf.mxu0 }
  0xd1   : > { %v445_v23 = vpack.c.bf16 %v400_v22, %v398_v20 }
  0xd3   : > { %525 = vmatmul.bf16.vlgmr.msra.gmra.mxu1 %v445_v23 }
  0xd6   : > { %v410_v24 = vpop.f32.mrf.mxu2 }
  0xd7   : > { %v447_v25 = vpack.c.bf16 %v410_v24, %v408_v21 }
  0xd8   : > { %v403_v26 = vpop.f32.mrf.mxu0 }
  0xd9   : > { %535 = vmatmul.bf16.vlgmr.msra.gmra.mxu3 %v447_v25 }
  0xde   : > { %v413_v27 = vpop.f32.mrf.mxu2 }
  0xe0   : > { %v405_v28 = vpop.f32.mrf.mxu0 }
  0xe1   : > { %v446_v29 = vpack.c.bf16 %v405_v28, %v403_v26 }
  0xe3   : > { %530 = vmatmul.bf16.gmra.mxu1 %v446_v29 }
  0xe6   : > { %v415_v30 = vpop.f32.mrf.mxu2 }
  0xe7   : > { %v448_v31 = vpack.c.bf16 %v415_v30, %v413_v27 }
  0xe9   : > { %540 = vmatmul.bf16.gmra.mxu3 %v448_v31 }
 0x150   : > { %v526_v32 = vpop.f32.mrf.mxu1 }
 0x151   : > { %v527_v34 = vadd.f32 %v937_v33, %v526_v32 }
 0x153   : > { %v546_v37 = vmax.f32 %v527_v34, 0.0 }
 0x158   : > { %v528_v35 = vpop.f32.mrf.mxu1 }
 0x159   : > { %v529_v36 = vadd.f32 %v937_v33, %v528_v35 }
 0x15b   : > { %v547_v38 = vmax.f32 %v529_v36, 0.0 }
 0x15c   : > { %v536_v39 = vpop.f32.mrf.mxu3 }
 0x15d   : > { %v814_v40 = vpack.c.bf16 %v547_v38, %v546_v37  ;;  %v537_v42 = vadd.f32 %v937_v33, %v536_v39 }
 0x15f   : > { %815 = vst [vmem:[%s265_s24] sm:$0xff] %v814_v40   ;;  %v550_v45 = vmax.f32 %v537_v42, 0.0 }
 0x160   : > { %v531_v41 = vpop.f32.mrf.mxu1 }
 0x161   : > { %v532_v46 = vadd.f32 %v937_v33, %v531_v41 }
 0x163   : > { %v548_v51 = vmax.f32 %v532_v46, 0.0 }
 0x164   : > { %v538_v43 = vpop.f32.mrf.mxu3 }
 0x165   : > { %v539_v44 = vadd.f32 %v937_v33, %v538_v43 }
 0x167   : > { %v551_v47 = vmax.f32 %v539_v44, 0.0 }
 0x168   : > { %v533_v48 = vpop.f32.mrf.mxu1 }
 0x169   : > { %v824_v49 = vpack.c.bf16 %v551_v47, %v550_v45  ;;  %v534_v50 = vadd.f32 %v937_v33, %v533_v48 }
 0x16b   : > { %832 = vst [vmem:[%s265_s24 + $0x10] sm:$0xff] %v824_v49   ;;  %v549_v52 = vmax.f32 %v534_v50, 0.0 }
 0x16c   : > { %v541_v53 = vpop.f32.mrf.mxu3 }
 0x16d   : > { %v819_v54 = vpack.c.bf16 %v549_v52, %v548_v51  ;;  %v542_v55 = vadd.f32 %v937_v33, %v541_v53 }
 0x16f   : > { %831 = vst [vmem:[%s265_s24 + $0x8] sm:$0xff] %v819_v54   ;;  %v552_v58 = vmax.f32 %v542_v55, 0.0 }
 0x174   : > { %v543_v56 = vpop.f32.mrf.mxu3 }
 0x175   : > { %v544_v57 = vadd.f32 %v937_v33, %v543_v56 }
 0x177   : > { %v553_v59 = vmax.f32 %v544_v57, 0.0 }
 0x179   : > { %v829_v60 = vpack.c.bf16 %v553_v59, %v552_v58 }
 0x17b   : > { %833 = vst [vmem:[%s265_s24 + $0x18] sm:$0xff] %v829_v60  }
 0x17c   : > { %1055 = shalt.err (!%p1052_p0)
}
 0x17d   : > { %s1120_s14 = smov 64   ;;  %s1121_s1 = smov 4  }
 0x17e   : > { %860 = dma.vmem_to_hbm [thread:$0]  (%p1229_p2), %s584_s5, 512, %s586_s6, %s571_s7, %s1120_s14, %s1120_s14, %s1121_s1  }
 0x17f PF: > { %s600_s23 = sand.u32 1, %s1094_s15   ;;  %p874_p4 = pnand %p695_p10, %p1194_p5 }
 0x180   : > { %s601_s24 = scalar_lea.sflag [#allocation5], %s600_s23 }
 0x181   : > { %p875_p6 = pneg %p874_p4 }
 0x183   : > { %1089 = dma.done.wait (%p875_p6), %s601_s24, 512  }
 0x184   : > { %1091 = vsyncadd (%p875_p6), %s601_s24, 4294966784  ;;  %s21_s20 = sadd.s32 1, %s1114_s20   ;;  %s1329_s15 = smov %s1098_s16 }
 0x185   : > { %p18_p8 = scmp.ge.s32.totalorder %s21_s20, 4   ;;  %s1330_s16 = smov %s1102_s17 }
 0x186   : > { %s1331_s17 = smov %s1239_s30  ;;  %s1332_s18 = smov %s1110_s19 }
 0x187   : > { %s1333_s19 = smov %s1335_s13  ;;  %20 = sbr.rel (!%p18_p8) target bundleno = 9 (0x9), region = 98 }
 0x18c   :  { %607 = vsyncpa [#allocation4], 1 }
 0x18d   :  { %609 = vsyncpa [#allocation4 + $0x1], 1 }
 0x18e   :  { %610 = vsyncpa [#allocation7], 1 }
 0x18f   :  { %611 = vsyncpa [#allocation5], 1 }
 0x190   :  { %613 = vsyncpa [#allocation5 + $0x1], 1 }

</bundles_post_ra>
